<compile_context>
chip_gen: v7x
topology: tpu7x:2x2x1
jax: 0.10.0
libtpu: 0.0.40
codegen_flags: <defaults>
</compile_context>

<pallas_src>
import functools

import jax
import jax.numpy as jnp
from jax.experimental import pallas as pl
from jax.experimental.pallas import tpu as pltpu


# ----------------------------- Pallas kernel --------------------------------

def _egnn_conv_kernel(x_ref, edge_ref, gsrc_ref, gdst_ref,
                      w_node_ref, w_edge_ref, w_cat_ref, b_cat_ref,
                      out_ref, *, n_src_pad, b, cout,
                      fuse_leaky_relu, neg_slope):
    f32 = jnp.float32
    bf16 = jnp.bfloat16
    bc = b * cout

    # 1. node projection for all stacked (src|dst) nodes, all batches at once:
    #    lanes = [B*Cout value proj | B k-scores | B q-scores]
    node_packed = jnp.dot(x_ref[...], w_node_ref[...],
                          preferred_element_type=f32)        # [N_all, bc+2b]
    src_packed = node_packed[:n_src_pad]                      # [N_src_pad, ...]
    dst_packed = node_packed[n_src_pad:]                      # [N_dst, ...]
    xv_dst = dst_packed[:, :bc]                               # [N_dst, bc]

    # 2. edge embedding + attention edge-score (b_att folded via ones column)
    edge_packed = jnp.dot(edge_ref[...], w_edge_ref[...],
                          preferred_element_type=f32)         # [E, cout+1]
    edge_emb = edge_packed[:, :cout]                          # [E, cout]
    e_score = edge_packed[:, cout:cout + 1]                   # [E, 1]

    # 3. gather x_j AND its q-score in a single one-hot matmul
    j_packed = jnp.dot(gsrc_ref[...], src_packed.astype(bf16),
                       preferred_element_type=f32)            # [E, bc+2b]
    x_j = j_packed[:, :bc]                                    # [E, bc]
    q_score = j_packed[:, bc + b: bc + 2 * b]                 # [E, b]

    # 4. gather the per-edge k-score from the destination side
    k_node = dst_packed[:, bc: bc + b].astype(bf16)           # [N_dst, b]
    k_score = jnp.dot(gdst_ref[...], k_node,
                      preferred_element_type=f32)             # [E, b]

    # 5. attention + gating (element-wise, f32)
    att = jax.nn.sigmoid(k_score + q_score + e_score)         # [E, b]
    gate = jax.nn.sigmoid(edge_emb)                           # [E, cout]
    e = att.shape[0]
    att_full = jnp.concatenate(
        [jnp.broadcast_to(att[:, bi:bi + 1], (e, cout)) for bi in range(b)],
        axis=-1)                                              # [E, bc]
    gate_full = jnp.concatenate([gate] * b, axis=-1)          # [E, bc]
    msg = (att_full * x_j * gate_full).astype(bf16)           # [E, bc]

    # 6. scatter-add to destination nodes, reusing the resident g_dst tile
    aggr = jax.lax.dot_general(gdst_ref[...], msg,
                               dimension_numbers=(((0,), (0,)), ((), ())),
                               preferred_element_type=f32)    # [N_dst, bc]

    # 7. update MLP + residual (+ fused inter-layer leaky_relu)
    cat_in = jnp.concatenate([xv_dst, aggr], axis=-1).astype(bf16)
    upd = jnp.dot(cat_in, w_cat_ref[...],
                  preferred_element_type=f32) + b_cat_ref[...]
    y = xv_dst + jnp.maximum(upd, 0.0)
    if fuse_leaky_relu:
        y = jnp.where(y >= 0.0, y, neg_slope * y)
    out_ref[...] = y


# ------------------------------ conv wrapper ---------------------------------

def egnn_conv_pallas(x_src, x_dst, edge_feat, src_idx, dst_idx, n_dst, params,
                     fuse_leaky_relu=False, neg_slope=0.01):
    """One MyEGNNConv layer with batch folded into lanes.
    x_src:[B,N_src,Cin], x_dst:[B,N_dst,Cin], edge_feat:[E,Ce],
    src_idx/dst_idx:[E] int32. Returns [B, N_dst, Cout]."""
    f32, bf16 = jnp.float32, jnp.bfloat16
    b, n_src, cin = x_src.shape
    assert x_dst.shape[0] == b and x_dst.shape[1] == n_dst
    e, ce = edge_feat.shape
    cout = params["value"].shape[1]
    bc = b * cout
    n_src_pad = ((n_src + 7) // 8) * 8          # align the in-kernel row split

    # ---- node feature slab [N_src_pad + N_dst, B*Cin] (batch -> lanes) -------
    def to_lanes(x):                             # [B, N, C] -> [N, B*C]
        return jnp.transpose(x, (1, 0, 2)).reshape(x.shape[1], b * x.shape[2])
    x_src_l = jnp.pad(to_lanes(x_src.astype(f32)),
                      ((0, n_src_pad - n_src), (0, 0)))
    x_all = jnp.concatenate([x_src_l, to_lanes(x_dst.astype(f32))],
                            axis=0).astype(bf16)

    # ---- exact 0/1 one-hot gather matrices in bf16 ---------------------------
    g_src = jax.nn.one_hot(src_idx, n_src_pad, dtype=bf16)    # [E, N_src_pad]
    g_dst = jax.nn.one_hot(dst_idx, n_dst, dtype=bf16)        # [E, N_dst]

    # ---- packed block-diagonal node weight: value | vk | vq ------------------
    value = params["value"].astype(f32)
    w_att = params["w_att"].astype(f32)                       # [3*Cout, 1]
    vk = value @ params["key"].astype(f32) @ w_att[:cout]            # [Cin,1]
    vq = value @ params["query"].astype(f32) @ w_att[cout:2 * cout]  # [Cin,1]
    w_node = jnp.zeros((b * cin, bc + 2 * b), f32)
    for bi in range(b):
        w_node = w_node.at[bi * cin:(bi + 1) * cin,
                           bi * cout:(bi + 1) * cout].set(value)
        w_node = w_node.at[bi * cin:(bi + 1) * cin, bc + bi].set(vk[:, 0])
        w_node = w_node.at[bi * cin:(bi + 1) * cin, bc + b + bi].set(vq[:, 0])
    w_node = w_node.astype(bf16)

    # ---- packed edge weight [Ce+1, Cout+1]: weight_e | we_att, b_att folded --
    we = params["weight_e"].astype(f32)
    we_att = we @ w_att[2 * cout:]                             # [Ce, 1]
    w_edge = jnp.zeros((ce + 1, cout + 1), f32)
    w_edge = w_edge.at[:ce, :cout].set(we)
    w_edge = w_edge.at[:ce, cout:cout + 1].set(we_att)
    w_edge = w_edge.at[ce, cout].set(params["b_att"].astype(f32)[0])
    w_edge = w_edge.astype(bf16)
    edge_aug = jnp.concatenate(
        [edge_feat.astype(f32), jnp.ones((e, 1), f32)], axis=-1).astype(bf16)

    # ---- packed block-diagonal update weight [2*bc, bc] and bias [1, bc] -----
    w_cat = params["w_cat"].astype(f32)
    w_cat_x, w_cat_a = w_cat[:cout], w_cat[cout:]
    w_cat_bd = jnp.zeros((2 * bc, bc), f32)
    for bi in range(b):
        w_cat_bd = w_cat_bd.at[bi * cout:(bi + 1) * cout,
                               bi * cout:(bi + 1) * cout].set(w_cat_x)
        w_cat_bd = w_cat_bd.at[bc + bi * cout:bc + (bi + 1) * cout,
                               bi * cout:(bi + 1) * cout].set(w_cat_a)
    w_cat_bd = w_cat_bd.astype(bf16)
    b_cat = jnp.tile(params["b_cat"].astype(f32).reshape(1, cout), (1, b))

    kernel = functools.partial(
        _egnn_conv_kernel, n_src_pad=n_src_pad, b=b, cout=cout,
        fuse_leaky_relu=fuse_leaky_relu, neg_slope=neg_slope)

    def full(shape):
        nd = len(shape)
        return pl.BlockSpec(shape, lambda i, _nd=nd: (0,) * _nd)

    out = pl.pallas_call(
        kernel,
        out_shape=jax.ShapeDtypeStruct((n_dst, bc), f32),
        grid_spec=pltpu.PrefetchScalarGridSpec(
            num_scalar_prefetch=0,
            grid=(1,),
            in_specs=[
                full((n_src_pad + n_dst, b * cin)),   # x_all
                full((e, ce + 1)),                    # edge features (+1s col)
                full((e, n_src_pad)),                 # one-hot gather (src)
                full((e, n_dst)),                     # one-hot gather (dst)
                full((b * cin, bc + 2 * b)),          # packed node weight
                full((ce + 1, cout + 1)),             # packed edge weight
                full((2 * bc, bc)),                   # packed update weight
                full((1, bc)),                        # update bias
            ],
            out_specs=full((n_dst, bc)),
        ),
        compiler_params=pltpu.CompilerParams(
            dimension_semantics=("arbitrary",)),
    )(x_all, edge_aug, g_src, g_dst, w_node, w_edge, w_cat_bd, b_cat)

    # [N_dst, B*Cout] -> [B, N_dst, Cout]
    return jnp.transpose(out.reshape(n_dst, b, cout), (1, 0, 2))


# ------------------------------ full network ---------------------------------

def egnn_net_forward(X, g, params, skip_connection=False):
    edge_index = g["edge_index"]
    edge_weight = g["edge_weight"]
    size = g["size"]
    res_n_id = g["res_n_id"]

    x_dst0 = X[:, res_n_id[0]]
    X1 = egnn_conv_pallas(X, x_dst0, edge_weight[0],
                          edge_index[0][0], edge_index[0][1],
                          size[0][1], params["conv1"],
                          fuse_leaky_relu=not skip_connection)
    if skip_connection:
        X1 = jnp.concatenate([jax.nn.leaky_relu(X1), X1], axis=-1)

    x_dst1 = X1[:, res_n_id[1]]
    X2 = egnn_conv_pallas(X1, x_dst1, edge_weight[1],
                          edge_index[1][0], edge_index[1][1],
                          size[1][1], params["conv2"],
                          fuse_leaky_relu=False)
    return X2


# ------------------------ pure-JAX reference (checking) ----------------------

def _egnn_conv_ref(x_src, x_dst, edge_feat, src_idx, dst_idx, n_dst, p):
    xv_src = x_src @ p["value"]
    xv_dst = x_dst @ p["value"]
    edge_emb = edge_feat @ p["weight_e"]                   # [E, Cout]
    x_j = xv_src[:, src_idx]                               # [B, E, Cout]
    x_i = xv_dst[:, dst_idx]
    q = x_j @ p["query"]
    k = x_i @ p["key"]
    edge_rep = jnp.broadcast_to(edge_emb, (x_j.shape[0],) + edge_emb.shape)
    att_feat = jnp.concatenate([k, q, edge_rep], axis=-1)
    att = jax.nn.sigmoid(att_feat @ p["w_att"] + p["b_att"])
    gate = jax.nn.sigmoid(edge_emb)
    msg = att * x_j * gate
    aggr = jnp.zeros((x_src.shape[0], n_dst, xv_dst.shape[-1]), jnp.float32)
    aggr = aggr.at[:, dst_idx].add(msg)
    cat = jnp.concatenate([xv_dst, aggr], axis=-1)
    return xv_dst + jax.nn.relu(cat @ p["w_cat"] + p["b_cat"])


def _egnn_net_ref(X, g, params, skip_connection=False):
    ei, ew, size, rid = g["edge_index"], g["edge_weight"], g["size"], g["res_n_id"]
    X1 = _egnn_conv_ref(X, X[:, rid[0]], ew[0], ei[0][0], ei[0][1],
                        size[0][1], params["conv1"])
    if skip_connection:
        X1 = jnp.concatenate([jax.nn.leaky_relu(X1), X1], axis=-1)
    else:
        X1 = jax.nn.leaky_relu(X1)
    return _egnn_conv_ref(X1, X1[:, rid[1]], ew[1], ei[1][0], ei[1][1],
                          size[1][1], params["conv2"])


# ------------------------------ param init -----------------------------------

def _xavier_uniform(key, shape):
    fan_in, fan_out = shape
    bound = (6.0 / (fan_in + fan_out)) ** 0.5
    return jax.random.uniform(key, shape, jnp.float32, -bound, bound)


def init_conv_params(key, cin, cout, ce):
    ks = jax.random.split(key, 8)
    return {
        "value": _xavier_uniform(ks[0], (cin, cout)),
        "key": _xavier_uniform(ks[1], (cout, cout)),
        "query": _xavier_uniform(ks[2], (cout, cout)),
        "weight_e": _xavier_uniform(ks[3], (ce, cout)),
        "w_att": _xavier_uniform(ks[4], (3 * cout, 1)),     # linear_att.weight.T
        "b_att": jax.random.uniform(ks[5], (1,), jnp.float32, -0.1, 0.1),
        "w_cat": _xavier_uniform(ks[6], (2 * cout, cout)),  # linear_concat.weight.T
        "b_cat": jax.random.uniform(ks[7], (cout,), jnp.float32, -0.1, 0.1),
    }


# --------------------------------- main ---------------------------------------

if __name__ == "__main__":
    key = jax.random.PRNGKey(0)
    kX, ke1s, ke1d, kw1, ke2s, ke2d, kw2, kp1, kp2 = jax.random.split(key, 9)

    # shapes
    B = 2
    N = 12               # input nodes
    IN_CH = 4
    SPATIAL_CH = 16      # conv1 out channels
    OUT_CH = 8           # conv2 out channels
    EDGE_CH = 4
    N_DST1, E1 = 8, 24   # layer-1 bipartite target nodes / edges
    N_DST2, E2 = 6, 16   # layer-2 bipartite target nodes / edges
    SKIP = False

    X = jax.random.normal(kX, (B, N, IN_CH), jnp.float32)

    edge_index_0 = jnp.stack([
        jax.random.randint(ke1s, (E1,), 0, N, jnp.int32),       # source in [0, N)
        jax.random.randint(ke1d, (E1,), 0, N_DST1, jnp.int32),  # target in [0, N_DST1)
    ])
    edge_index_1 = jnp.stack([
        jax.random.randint(ke2s, (E2,), 0, N_DST1, jnp.int32),
        jax.random.randint(ke2d, (E2,), 0, N_DST2, jnp.int32),
    ])
    g = {
        "edge_index": [edge_index_0, edge_index_1],
        "edge_weight": [jax.random.normal(kw1, (E1, EDGE_CH), jnp.float32),
                        jax.random.normal(kw2, (E2, EDGE_CH), jnp.float32)],
        "size": [(N, N_DST1), (N_DST1, N_DST2)],
        "res_n_id": [jnp.arange(N_DST1, dtype=jnp.int32),
                     jnp.arange(N_DST2, dtype=jnp.int32)],
    }

    conv2_in = SPATIAL_CH * 2 if SKIP else SPATIAL_CH
    params = {
        "conv1": init_conv_params(kp1, IN_CH, SPATIAL_CH, EDGE_CH),
        "conv2": init_conv_params(kp2, conv2_in, OUT_CH, EDGE_CH),
    }

    out = egnn_net_forward(X, g, params, skip_connection=SKIP)
    out = jax.block_until_ready(out)

    ref = _egnn_net_ref(X, g, params, skip_connection=SKIP)
    assert out.shape == (B, N_DST2, OUT_CH), out.shape
    # bf16 matmul operands (f32 accumulation) -> loosened tolerance vs the
    # pure-f32 reference, per the performance review.
    assert jnp.allclose(out, ref, atol=1e-1, rtol=1e-1), \
        float(jnp.max(jnp.abs(out - ref)))

    print("KERNEL_OK")
</pallas_src>

<mosaic_0001>
module attributes {stable_mosaic.version = 11 : i64} {
  func.func @_egnn_conv_kernel(%arg0: i32, %arg1: memref<24x8xbf16, #tpu.memory_space<vmem>>, %arg2: memref<24x5xbf16, #tpu.memory_space<vmem>>, %arg3: memref<24x16xbf16, #tpu.memory_space<vmem>>, %arg4: memref<24x8xbf16, #tpu.memory_space<vmem>>, %arg5: memref<8x36xbf16, #tpu.memory_space<vmem>>, %arg6: memref<5x17xbf16, #tpu.memory_space<vmem>>, %arg7: memref<64x32xbf16, #tpu.memory_space<vmem>>, %arg8: memref<1x32xf32, #tpu.memory_space<vmem>>, %arg9: memref<8x32xf32, #tpu.memory_space<vmem>>) attributes {dimension_semantics = [#tpu.dimension_semantics<arbitrary>], iteration_bounds = array<i64: 1>, scalar_prefetch = 0 : i64, scratch_operands = 0 : i64, tpu.core_type = #tpu.core_type<tc>, window_params = [{pipeline_mode = #tpu.pipeline_mode<synchronous>, transform_indices = @transform_0, window_bounds = array<i64: 24, 8>}, {pipeline_mode = #tpu.pipeline_mode<synchronous>, transform_indices = @transform_1, window_bounds = array<i64: 24, 5>}, {pipeline_mode = #tpu.pipeline_mode<synchronous>, transform_indices = @transform_2, window_bounds = array<i64: 24, 16>}, {pipeline_mode = #tpu.pipeline_mode<synchronous>, transform_indices = @transform_3, window_bounds = array<i64: 24, 8>}, {pipeline_mode = #tpu.pipeline_mode<synchronous>, transform_indices = @transform_4, window_bounds = array<i64: 8, 36>}, {pipeline_mode = #tpu.pipeline_mode<synchronous>, transform_indices = @transform_5, window_bounds = array<i64: 5, 17>}, {pipeline_mode = #tpu.pipeline_mode<synchronous>, transform_indices = @transform_6, window_bounds = array<i64: 64, 32>}, {pipeline_mode = #tpu.pipeline_mode<synchronous>, transform_indices = @transform_7, window_bounds = array<i64: 1, 32>}, {pipeline_mode = #tpu.pipeline_mode<synchronous>, transform_indices = @transform_8, window_bounds = array<i64: 8, 32>}]} {
    %c0 = arith.constant 0 : index
    %c0_0 = arith.constant 0 : index
    %0 = vector.load %arg1[%c0, %c0_0] : memref<24x8xbf16, #tpu.memory_space<vmem>>, vector<24x8xbf16>
    %c0_1 = arith.constant 0 : index
    %c0_2 = arith.constant 0 : index
    %1 = vector.load %arg5[%c0_1, %c0_2] : memref<8x36xbf16, #tpu.memory_space<vmem>>, vector<8x36xbf16>
    %cst = arith.constant dense<0.000000e+00> : vector<24x36xf32>
    %2 = tpu.matmul %0, %1, %cst {dimension_numbers = #tpu.dot_dimension_numbers<[1], [0], [0], [1], [0, 0, 1, 1], [], []>} : vector<24x8xbf16>, vector<8x36xbf16>, vector<24x36xf32> -> vector<24x36xf32>
    %3 = vector.extract_strided_slice %2 {offsets = [0, 0], sizes = [16, 36], strides = [1, 1]} : vector<24x36xf32> to vector<16x36xf32>
    %4 = vector.extract_strided_slice %2 {offsets = [16, 0], sizes = [8, 36], strides = [1, 1]} : vector<24x36xf32> to vector<8x36xf32>
    %5 = vector.extract_strided_slice %4 {offsets = [0, 0], sizes = [8, 32], strides = [1, 1]} : vector<8x36xf32> to vector<8x32xf32>
    %c0_3 = arith.constant 0 : index
    %c0_4 = arith.constant 0 : index
    %6 = vector.load %arg2[%c0_3, %c0_4] : memref<24x5xbf16, #tpu.memory_space<vmem>>, vector<24x5xbf16>
    %c0_5 = arith.constant 0 : index
    %c0_6 = arith.constant 0 : index
    %7 = vector.load %arg6[%c0_5, %c0_6] : memref<5x17xbf16, #tpu.memory_space<vmem>>, vector<5x17xbf16>
    %cst_7 = arith.constant dense<0.000000e+00> : vector<24x17xf32>
    %8 = tpu.matmul %6, %7, %cst_7 {dimension_numbers = #tpu.dot_dimension_numbers<[1], [0], [0], [1], [0, 0, 1, 1], [], []>} : vector<24x5xbf16>, vector<5x17xbf16>, vector<24x17xf32> -> vector<24x17xf32>
    %9 = vector.extract_strided_slice %8 {offsets = [0, 0], sizes = [24, 16], strides = [1, 1]} : vector<24x17xf32> to vector<24x16xf32>
    %10 = vector.extract_strided_slice %8 {offsets = [0, 16], sizes = [24, 1], strides = [1, 1]} : vector<24x17xf32> to vector<24x1xf32>
    %c0_8 = arith.constant 0 : index
    %c0_9 = arith.constant 0 : index
    %11 = vector.load %arg3[%c0_8, %c0_9] : memref<24x16xbf16, #tpu.memory_space<vmem>>, vector<24x16xbf16>
    %12 = arith.truncf %3 : vector<16x36xf32> to vector<16x36xbf16>
    %cst_10 = arith.constant dense<0.000000e+00> : vector<24x36xf32>
    %13 = tpu.matmul %11, %12, %cst_10 {dimension_numbers = #tpu.dot_dimension_numbers<[1], [0], [0], [1], [0, 0, 1, 1], [], []>} : vector<24x16xbf16>, vector<16x36xbf16>, vector<24x36xf32> -> vector<24x36xf32>
    %14 = vector.extract_strided_slice %13 {offsets = [0, 0], sizes = [24, 32], strides = [1, 1]} : vector<24x36xf32> to vector<24x32xf32>
    %15 = vector.extract_strided_slice %13 {offsets = [0, 34], sizes = [24, 2], strides = [1, 1]} : vector<24x36xf32> to vector<24x2xf32>
    %16 = vector.extract_strided_slice %4 {offsets = [0, 32], sizes = [8, 2], strides = [1, 1]} : vector<8x36xf32> to vector<8x2xf32>
    %17 = arith.truncf %16 : vector<8x2xf32> to vector<8x2xbf16>
    %c0_11 = arith.constant 0 : index
    %c0_12 = arith.constant 0 : index
    %18 = vector.load %arg4[%c0_11, %c0_12] : memref<24x8xbf16, #tpu.memory_space<vmem>>, vector<24x8xbf16>
    %cst_13 = arith.constant dense<0.000000e+00> : vector<24x2xf32>
    %19 = tpu.matmul %18, %17, %cst_13 {dimension_numbers = #tpu.dot_dimension_numbers<[1], [0], [0], [1], [0, 0, 1, 1], [], []>} : vector<24x8xbf16>, vector<8x2xbf16>, vector<24x2xf32> -> vector<24x2xf32>
    %20 = arith.addf %19, %15 : vector<24x2xf32>
    %21 = vector.broadcast %10 : vector<24x1xf32> to vector<24x2xf32>
    %22 = arith.addf %20, %21 : vector<24x2xf32>
    %23 = arith.negf %22 : vector<24x2xf32>
    %24 = math.exp %23 : vector<24x2xf32>
    %cst_14 = arith.constant 1.000000e+00 : f32
    %25 = vector.broadcast %cst_14 : f32 to vector<24x2xf32>
    %26 = arith.addf %25, %24 : vector<24x2xf32>
    %27 = arith.divf %25, %26 : vector<24x2xf32>
    %28 = arith.negf %9 : vector<24x16xf32>
    %29 = math.exp %28 : vector<24x16xf32>
    %cst_15 = arith.constant 1.000000e+00 : f32
    %30 = vector.broadcast %cst_15 : f32 to vector<24x16xf32>
    %31 = arith.addf %30, %29 : vector<24x16xf32>
    %32 = arith.divf %30, %31 : vector<24x16xf32>
    %33 = vector.extract_strided_slice %27 {offsets = [0, 0], sizes = [24, 1], strides = [1, 1]} : vector<24x2xf32> to vector<24x1xf32>
    %34 = vector.shape_cast %33 : vector<24x1xf32> to vector<24x1xf32>
    %35 = vector.broadcast %34 : vector<24x1xf32> to vector<24x16xf32>
    %36 = vector.extract_strided_slice %27 {offsets = [0, 1], sizes = [24, 1], strides = [1, 1]} : vector<24x2xf32> to vector<24x1xf32>
    %37 = vector.shape_cast %36 : vector<24x1xf32> to vector<24x1xf32>
    %38 = vector.broadcast %37 : vector<24x1xf32> to vector<24x16xf32>
    %39 = tpu.concatenate %35, %38 in 1 : vector<24x16xf32>, vector<24x16xf32> -> vector<24x32xf32>
    %40 = tpu.concatenate %32, %32 in 1 : vector<24x16xf32>, vector<24x16xf32> -> vector<24x32xf32>
    %41 = arith.mulf %39, %14 : vector<24x32xf32>
    %42 = arith.mulf %41, %40 : vector<24x32xf32>
    %43 = arith.truncf %42 : vector<24x32xf32> to vector<24x32xbf16>
    %c0_16 = arith.constant 0 : index
    %c0_17 = arith.constant 0 : index
    %44 = vector.load %arg4[%c0_16, %c0_17] : memref<24x8xbf16, #tpu.memory_space<vmem>>, vector<24x8xbf16>
    %cst_18 = arith.constant dense<0.000000e+00> : vector<8x32xf32>
    %45 = tpu.matmul %44, %43, %cst_18 {dimension_numbers = #tpu.dot_dimension_numbers<[0], [0], [1], [1], [0, 1, 1, 1], [], []>} : vector<24x8xbf16>, vector<24x32xbf16>, vector<8x32xf32> -> vector<8x32xf32>
    %46 = tpu.concatenate %5, %45 in 1 : vector<8x32xf32>, vector<8x32xf32> -> vector<8x64xf32>
    %47 = arith.truncf %46 : vector<8x64xf32> to vector<8x64xbf16>
    %c0_19 = arith.constant 0 : index
    %c0_20 = arith.constant 0 : index
    %48 = vector.load %arg7[%c0_19, %c0_20] : memref<64x32xbf16, #tpu.memory_space<vmem>>, vector<64x32xbf16>
    %cst_21 = arith.constant dense<0.000000e+00> : vector<8x32xf32>
    %49 = tpu.matmul %47, %48, %cst_21 {dimension_numbers = #tpu.dot_dimension_numbers<[1], [0], [0], [1], [0, 0, 1, 1], [], []>} : vector<8x64xbf16>, vector<64x32xbf16>, vector<8x32xf32> -> vector<8x32xf32>
    %c0_22 = arith.constant 0 : index
    %c0_23 = arith.constant 0 : index
    %50 = vector.load %arg8[%c0_22, %c0_23] : memref<1x32xf32, #tpu.memory_space<vmem>>, vector<1x32xf32>
    %51 = vector.broadcast %50 : vector<1x32xf32> to vector<8x32xf32>
    %52 = arith.addf %49, %51 : vector<8x32xf32>
    %cst_24 = arith.constant 0.000000e+00 : f32
    %53 = vector.broadcast %cst_24 : f32 to vector<8x32xf32>
    %54 = arith.maximumf %52, %53 : vector<8x32xf32>
    %55 = arith.addf %5, %54 : vector<8x32xf32>
    %cst_25 = arith.constant 0.000000e+00 : f32
    %56 = vector.broadcast %cst_25 : f32 to vector<8x32xf32>
    %57 = arith.cmpf oge, %55, %56 : vector<8x32xf32>
    %cst_26 = arith.constant 0.00999999977 : f32
    %58 = vector.broadcast %cst_26 : f32 to vector<8x32xf32>
    %59 = arith.mulf %58, %55 : vector<8x32xf32>
    %60 = arith.select %57, %55, %59 : vector<8x32xi1>, vector<8x32xf32>
    %c0_27 = arith.constant 0 : index
    %c0_28 = arith.constant 0 : index
    %61 = vector.load %arg9[%c0_27, %c0_28] : memref<8x32xf32, #tpu.memory_space<vmem>>, vector<8x32xf32>
    tpu.vector_store %arg9[%c0_27, %c0_28], %60 {strides = array<i32>} : memref<8x32xf32, #tpu.memory_space<vmem>>, vector<8x32xf32>,
    return
  }
  func.func @transform_0(%arg0: i32) -> (i32, i32) {
    %c0_i32 = arith.constant 0 : i32
    %c0_i32_0 = arith.constant 0 : i32
    %c0_i32_1 = arith.constant 0 : i32
    return %c0_i32, %c0_i32_0 : i32, i32
  }
  func.func @transform_1(%arg0: i32) -> (i32, i32) {
    %c0_i32 = arith.constant 0 : i32
    %c0_i32_0 = arith.constant 0 : i32
    %c0_i32_1 = arith.constant 0 : i32
    return %c0_i32, %c0_i32_0 : i32, i32
  }
  func.func @transform_2(%arg0: i32) -> (i32, i32) {
    %c0_i32 = arith.constant 0 : i32
    %c0_i32_0 = arith.constant 0 : i32
    %c0_i32_1 = arith.constant 0 : i32
    return %c0_i32, %c0_i32_0 : i32, i32
  }
  func.func @transform_3(%arg0: i32) -> (i32, i32) {
    %c0_i32 = arith.constant 0 : i32
    %c0_i32_0 = arith.constant 0 : i32
    %c0_i32_1 = arith.constant 0 : i32
    return %c0_i32, %c0_i32_0 : i32, i32
  }
  func.func @transform_4(%arg0: i32) -> (i32, i32) {
    %c0_i32 = arith.constant 0 : i32
    %c0_i32_0 = arith.constant 0 : i32
    %c0_i32_1 = arith.constant 0 : i32
    return %c0_i32, %c0_i32_0 : i32, i32
  }
  func.func @transform_5(%arg0: i32) -> (i32, i32) {
    %c0_i32 = arith.constant 0 : i32
    %c0_i32_0 = arith.constant 0 : i32
    %c0_i32_1 = arith.constant 0 : i32
    return %c0_i32, %c0_i32_0 : i32, i32
  }
  func.func @transform_6(%arg0: i32) -> (i32, i32) {
    %c0_i32 = arith.constant 0 : i32
    %c0_i32_0 = arith.constant 0 : i32
    %c0_i32_1 = arith.constant 0 : i32
    return %c0_i32, %c0_i32_0 : i32, i32
  }
  func.func @transform_7(%arg0: i32) -> (i32, i32) {
    %c0_i32 = arith.constant 0 : i32
    %c0_i32_0 = arith.constant 0 : i32
    %c0_i32_1 = arith.constant 0 : i32
    return %c0_i32, %c0_i32_0 : i32, i32
  }
  func.func @transform_8(%arg0: i32) -> (i32, i32) {
    %c0_i32 = arith.constant 0 : i32
    %c0_i32_0 = arith.constant 0 : i32
    %c0_i32_1 = arith.constant 0 : i32
    return %c0_i32, %c0_i32_0 : i32, i32
  }
}

</mosaic_0001>

<bundles_post_ra>
// kernel: tpu_custom_call.1
= control target key start
LH: loop header
LB: loop body
LE: loop exit
PB: predicated region body
PF: predicated region fallthrough
CT: control target
= control target key end

     0   :  { %vm50_vm0 = vcmask 1043456   ;;  %vm43_vm1 = vcmask 64512   ;;  %vm121_vm2 = vcmask 1041408   ;;  %vm122_vm3 = vcmask 1042432   ;;  %s943_s0 = inlined_call_operand.vmem [shape: bf16[24,8], index: 0, kind: input, shape index: {}]   ;;  %s944_s1 = inlined_call_operand.vmem [shape: bf16[24,5], index: 1, kind: input, shape index: {}]   ;;  %s945_s2 = inlined_call_operand.vmem [shape: bf16[24,16], index: 2, kind: input, shape index: {}]   ;;  %s946_s3 = inlined_call_operand.vmem [shape: bf16[24,8], index: 3, kind: input, shape index: {}]   ;;  %s947_s4 = inlined_call_operand.vmem [shape: bf16[8,36], index: 4, kind: input, shape index: {}]   ;;  %s948_s5 = inlined_call_operand.vmem [shape: bf16[5,17], index: 5, kind: input, shape index: {}]   ;;  %s949_s6 = inlined_call_operand.vmem [shape: bf16[64,32], index: 6, kind: input, shape index: {}]   ;;  %s950_s7 = inlined_call_operand.vmem [shape: f32[1,32], index: 7, kind: input, shape index: {}]   ;;  %s951_s8 = inlined_call_operand.hbm [shape: f32[8,32], index: 8, kind: output, shape index: {}]  }
   0x1   :  { %v34_v0 = vld [vmem:[%s947_s4] sm:$0xf]  ;;  %v723_v3 = vld [vmem:[%s943_s0 + $0x8] ss:$0 sps:$4 sm:$0xff]   ;;  %v782_v6 = vmov 65535   ;;  %vm114_vm4 = vcmask 39936  }
   0x2   :  { %v722_v1 = vld [vmem:[%s943_s0] sm:$0xff]   ;;  %702 = vmatprep.subr.msk.bf16.mxu0 %vm50_vm0, %v34_v0  ;;  %v52_v2 = vsel %vm50_vm0, %v34_v0, 0  ;;  %v123_v7 = vsel %vm121_vm2, 4294967295, %v782_v6  ;;  %v725_v10 = vld [vmem:[%s944_s1 + $0x8] ss:$0 sps:$4 sm:$0xff]  }
   0x3   :  { %659 = vmatpush3.bf16.msra.mxu0 %v52_v2  ;;  %660 = vmatprep.mubr.msk.bf16.mxu0 %vm43_vm1, %v722_v1  ;;  %v105_v4 = vld [vmem:[%s948_s5] sm:$0x7]  ;;  %v124_v8 = vsel %vm122_vm3, %v123_v7, 0 }
   0x4   :  { %v724_v5 = vld [vmem:[%s944_s1] sm:$0xff]   ;;  %v126_v9 = vand.u32 %v124_v8, %v105_v4 }
   0x5   :  { %666 = vmatprep.mubr.msk.bf16.mxu1 %vm114_vm4, %v724_v5 }
   0x6   :  { %661 = vmatmul.mubr.msk.bf16.vlgmr.msra.gmra.mrb[0].mxu0 %vm43_vm1, %v723_v3  ;;  %664 = vmatprep.subr.bf16.mxu1 %v126_v9 }
   0x7   :  { %665 = vmatpush3.bf16.msra.mxu1 %v126_v9 }
   0x8   :  { %13 = vsyncpa [#allocation3], 0  ;;  %v726_v11 = vld [vmem:[%s945_s2] sm:$0xff]   ;;  %vm188_vm5 = vcmask 130048   ;;  %v783_v13 = vmov 16   ;;  %s784_s1 = smov 96  }
   0x9   :  { %672 = vmatprep.mubr.msk.bf16.mxu0 %vm188_vm5, %v726_v11  ;;  %v867_v12 = vld [vmem:[%s946_s3] sm:$0xff]   ;;  %715 = vset.pattern.permute.xlu1 %v783_v13  ;;  %v727_v20 = vld [vmem:[%s945_s2 + $0x8] ss:$0 sps:$4 sm:$0xff]   ;;  %s785_s2 = smov 94   ;;  %v786_v32 = vmov 0   ;;  %v787_v5 = vmov 1  }
   0xa   :  { %667 = vmatmul.mubr.msk.bf16.vlgmr.msra.gmra.mrb[0].mxu1 %vm114_vm4, %v725_v10  ;;  %716 = vset.pattern.permute.xlu0 %v783_v13  ;;  %v884_v27 = vld [vmem:[%s946_s3 + $0x8] ss:$0 sps:$4 sm:$0xff]   ;;  %s788_s3 = smov 16   ;;  %v789_v10 = vmov 0.0   ;;  %vm790_vm6 = vmmov 0   ;;  %vm452_vm7 = vcmask 195584  }
   0xb   :  { %678 = vmatprep.mubr.msk.bf16.mxu1 %vm43_vm1, %v867_v12  ;;  %s791_s30 = smov 32   ;;  %vm503_vm8 = vcmask 261120   ;;  %vm545_vm9 = vcmask 523264  }
  0xd9   :  { %v871_v14 = vpop.f32.mrb[0].mxu0 }
  0xda   :  { %v88_v15 = vpop.f32.mrb[1].mxu0  ;;  %v243_v16 = vpack.c.bf16 %v871_v14, %v871_v14 }
  0xdb   :  { %v663_v17 = vpop.f32.mrb[2].mxu0 }
  0xdc   :  { %256 = vrot.lane.b32.xlu0 %v243_v16, %s784_s1  ;;  %v91_v18 = vpop.f32.mrb[3].mxu0 }
  0xdd   :  { %v179_v19 = vpack.c.bf16 %v91_v18, %v88_v15  ;;  %v668_v21 = vpop.f32.mrb[0].mxu1 }
  0xde   :  { %339 = vperm.xlu1 %715, %v668_v21   ;;  %v162_v22 = vpop.f32.mrb[1].mxu1  ;;  %v630_v53 = vmul.f32 -1.442695, %v668_v21 }
  0xdf   :  { %670 = vmatprep.subr.bf16.mxu0 %v179_v19  ;;  %v669_v23 = vpop.f32.mrb[2].mxu1  ;;  %v628_v51 = vmul.f32 -1.442695, %v162_v22 }
  0xe0   :  { %671 = vmatpush3.bf16.msra.mxu0 %v179_v19  ;;  %329 = vperm.xlu0 %716, %v162_v22   ;;  %v165_v24 = vpop.f32.mrb[3].mxu1 }
  0xe1   :  { %v629_v57 = vmul.f32 -1.442695, %v165_v24  ;;  %682 = vmatprep.subr.bf16.mxu0 %v789_v10 }
  0xe2   :  { %334 = vperm.xlu1 %715, %v165_v24  }
  0xe3   :  { %673 = vmatmul.mubr.msk.bf16.vlgmr.msra.gmra.mrb[4].mxu0 %vm188_vm5, %v727_v20 }
  0xe4   :  { %719 = vset.pattern.permute.xlu0 %v786_v32  ;;  %686 = vmatprep.mubr.msk.bf16.mxu0 %vm790_vm6, %v789_v10 }
  0xe6   :  { %717 = vset.pattern.permute.xlu1 %v786_v32 }
 0x14e   :  { %v257_v25 = vpop.permute.xlu0 %256 }
 0x14f   :  { %v277_v26 = vsel %vm50_vm0, %v257_v25, 0  ;;  %703 = vmatprep.subr.msk.bf16.mxu1 %vm50_vm0, %v257_v25 }
 0x150   :  { %677 = vmatpush3.bf16.msra.mxu1 %v277_v26 }
 0x151   :  { %690 = vmatprep.subr.bf16.mxu1 %v789_v10 }
 0x153   :  { %679 = vmatmul.mubr.msk.bf16.vlgmr.msra.gmra.mrb[4].mxu1 %vm43_vm1, %v884_v27 }
 0x154   :  { %698 = vmatprep.mubr.msk.bf16.mxu1 %vm790_vm6, %v789_v10 }
 0x15d   :  { %v340_v33 = vpop.permute.xlu1 %339 }
 0x15f   :  { %v330_v37 = vpop.permute.xlu0 %329 }
 0x161   :  { %v335_v34 = vpop.permute.xlu1 %334 }
 0x1b6   :  { %v888_v28 = vpop.f32.mrb[4].mxu0 }
 0x1b7   :  { %v890_v29 = vpop.f32.mrb[5].mxu0 }
 0x1b8   :  { %261 = vrot.lane.b32.xlu1 %v890_v29, %s785_s2  ;;  %v675_v30 = vpop.f32.mrb[6].mxu0 }
 0x1b9   :  { %v893_v31 = vpop.f32.mrb[7].mxu0 }
 0x1ba   :  { %263 = vrot.lane.b32.xlu0 %v893_v31, %s785_s2 }
 0x1bc   :  { %265 = vrot.lane.b32.xlu1 %v888_v28, %s785_s2 }
 0x226   :  { %v680_v35 = vpop.f32.mrb[4].mxu1 }
 0x227   :  { %v313_v36 = vpop.f32.mrb[5].mxu1 }
 0x228   :  { %v681_v38 = vpop.f32.mrb[6].mxu1 }
 0x229   :  { %v316_v39 = vpop.f32.mrb[7].mxu1 }
 0x22a   :  { %v262_v40 = vpop.permute.xlu1 %261 }
 0x22b   :  { %v314_v41 = vadd.f32 %v313_v36, %v262_v40  ;;  %v733_v40 = vld [vmem:[%s949_s6 + $0x18] sm:$0xff]  }
 0x22c   :  { %v264_v42 = vpop.permute.xlu0 %263 }
 0x22d   :  { %v342_v43 = vadd.f32 %v330_v37, %v314_v41  ;;  %v317_v44 = vadd.f32 %v316_v39, %v264_v42  ;;  %v732_v39 = vld [vmem:[%s949_s6 + $0x10] sm:$0xff]  }
 0x22e   :  { %v266_v45 = vpop.permute.xlu1 %265 }
 0x22f   :  { %v625_v46 = vmul.f32 -1.442695, %v342_v43  ;;  %v343_v47 = vadd.f32 %v335_v34, %v317_v44  ;;  %v322_v48 = vadd.f32 %v680_v35, %v266_v45 }
 0x231   :  { %734 = vpow2.f32 %v625_v46  ;;  %v626_v49 = vmul.f32 -1.442695, %v343_v47  ;;  %v344_v50 = vadd.f32 %v340_v33, %v322_v48  ;;  %v632_v48 = vld [vmem:[%s950_s7] ss:$0 sm:$0xff] }
 0x233   :  { %736 = vpow2.f32 %v626_v49  ;;  %v627_v52 = vmul.f32 -1.442695, %v344_v50 }
 0x235   :  { %738 = vpow2.f32 %v627_v52 }
 0x236   :  { %740 = vpow2.f32 %v628_v51 }
 0x237   :  { %742 = vpow2.f32 %v630_v53 }
 0x23b   :  { %v735_v54 = vpop.eup %734 }
 0x23c   :  { %v354_v55 = vadd.f32 1.0, %v735_v54 }
 0x23d   :  { %v737_v56 = vpop.eup %736 }
 0x23e   :  { %744 = vrcp.f32 %v354_v55  ;;  %v355_v59 = vadd.f32 1.0, %v737_v56 }
 0x23f   :  { %v739_v58 = vpop.eup %738  ;;  %746 = vpow2.f32 %v629_v57 }
 0x240   :  { %v741_v60 = vpop.eup %740  ;;  %v356_v61 = vadd.f32 1.0, %v739_v58 }
 0x241   :  { %v372_v62 = vadd.f32 1.0, %v741_v60  ;;  %v743_v63 = vpop.eup %742 }
 0x242   :  { %748 = vrcp.f32 %v356_v61  ;;  %v374_v0 = vadd.f32 1.0, %v743_v63 }
 0x243   :  { %750 = vrcp.f32 %v355_v59 }
 0x244   :  { %752 = vrcp.f32 %v372_v62 }
 0x245   :  { %754 = vrcp.f32 %v374_v0 }
 0x248   :  { %v745_v1 = vpop.eup %744 }
 0x249   :  { %383 = vperm.xlu0 %719, %v745_v1   ;;  %v747_v2 = vpop.eup %746 }
 0x24a   :  { %v373_v6 = vadd.f32 1.0, %v747_v2 }
 0x24c   :  { %v749_v3 = vpop.eup %748  ;;  %756 = vrcp.f32 %v373_v6 }
 0x24d   :  { %v751_v4 = vpop.eup %750  ;;  %393 = vperm.xlu1 %717, %v749_v3   ;;  %721 = vset.pattern.permute.xlu0 %v787_v5 }
 0x24e   :  { %401 = vperm.xlu0 %721, %v751_v4   ;;  %v753_v7 = vpop.eup %752 }
 0x24f   :  { %v755_v8 = vpop.eup %754 }
 0x251   :  { %718 = vset.pattern.permute.xlu1 %v787_v5 }
 0x252   :  { %405 = vperm.xlu1 %718, %v749_v3   ;;  %414 = vrot.lane.b32.xlu0 %v753_v7, %s788_s3 }
 0x256   :  { %397 = vperm.xlu1 %718, %v745_v1   ;;  %418 = vrot.lane.b32.xlu0 %v755_v8, %s788_s3  ;;  %v757_v9 = vpop.eup %756 }
 0x25a   :  { %720 = vset.pattern.permute.xlu1 %v786_v32 }
 0x25b   :  { %388 = vperm.xlu1 %720, %v751_v4  }
 0x25f   :  { %416 = vrot.lane.b32.xlu1 %v757_v9, %s788_s3 }
 0x282   :  { %436 = vxpose.xlu1.c.b16.start [1/2] (short) (narrow) %v867_v12, 16 }
 0x286   :  { %437 = vxpose.xlu1.c.b16.end [2/2] (short) (narrow) %v884_v27, 16 }
 0x2c8   :  { %v384_v11 = vpop.permute.xlu0 %383 }
 0x2cc   :  { %v394_v13 = vpop.permute.xlu1 %393 }
 0x2cd   :  { %v402_v15 = vpop.permute.xlu0 %401 }
 0x2d1   :  { %v406_v16 = vpop.permute.xlu1 %405  ;;  %v415_v17 = vpop.permute.xlu0 %414 }
 0x2d2   :  { %v410_v21 = vsel %vm188_vm5, %v394_v13, %v406_v16  ;;  %v423_v30 = vsel %vm188_vm5, %v753_v7, %v415_v17 }
 0x2d3   :  { %v428_v25 = vmul.f32 %v888_v28, %v410_v21  ;;  %v730_v28 = vld [vmem:[%s949_s6] sm:$0xff]  }
 0x2d4   :  { %691 = vmatpush3.bf16.msra.mxu1 %v730_v28 }
 0x2d5   :  { %v398_v18 = vpop.permute.xlu1 %397  ;;  %v419_v20 = vpop.permute.xlu0 %418  ;;  %692 = vmatprep.subr.bf16.mxu1 %v789_v10 }
 0x2d6   :  { %v408_v19 = vsel %vm188_vm5, %v384_v11, %v398_v18  ;;  %v425_v12 = vsel %vm188_vm5, %v755_v8, %v419_v20 }
 0x2d7   :  { %v426_v24 = vmul.f32 %v408_v19, %v890_v29  ;;  %v431_v32 = vmul.f32 %v428_v25, %v425_v12 }
 0x2d9   :  { %v429_v34 = vmul.f32 %v426_v24, %v423_v30  ;;  %v433_v37 = vpack.c.bf16 %v431_v32, %v431_v32 }
 0x2da   :  { %v389_v22 = vpop.permute.xlu1 %388 }
 0x2db   :  { %v409_v23 = vsel %vm188_vm5, %v389_v22, %v402_v15  ;;  %v457_v29 = vsel %vm50_vm0, %v433_v37, 0 }
 0x2dc   :  { %v427_v26 = vmul.f32 %v409_v23, %v893_v31  ;;  %v731_v31 = vld [vmem:[%s949_s6 + $0x8] sm:$0xff]   ;;  %s792_s6 = smov [#allocation2]  }
 0x2dd   :  { %693 = vmatpush3.bf16.msra.mxu1 %v731_v31  ;;  %s601_s11 = sshll.u32 %s792_s6, 4  ;;  %s602_s11 = int_to_ptr.vmem [resolvable:$true] %s601_s11 }
 0x2de   :  { %v417_v27 = vpop.permute.xlu1 %416  ;;  %694 = vmatprep.subr.bf16.mxu1 %v789_v10  ;;  %s758_s12 = scalar_lea.vmem %s602_s11, 128  ;;  %p763_p1 = scmp.lt.s32.totalorder %s602_s11, %s602_s11 }
 0x2df   :  { %v424_v33 = vsel %vm188_vm5, %v757_v9, %v417_v27  ;;  %p759_p0 = scmp.ne.s32.totalorder %s602_s11, %s758_s12  ;;  %p764_p2 = scmp.lt.s32.totalorder %s758_s12, %s758_s12 }
 0x2e0   :  { %v430_v35 = vmul.f32 %v427_v26, %v424_v33 }
 0x2e1   :  { %695 = vmatpush3.bf16.msra.mxu1 %v732_v39  ;;  %p765_p3 = por %p764_p2, %p763_p1 }
 0x2e2   :  { %v432_v36 = vpack.c.bf16 %v430_v35, %v429_v34  ;;  %696 = vmatprep.subr.bf16.mxu1 %v789_v10 }
 0x2e3   :  { %p766_p4 = pnand %p765_p3, %p759_p0 }
 0x2e4   :  { %683 = vmatpush3.bf16.msra.mxu0 %v432_v36 }
 0x2e5   :  { %684 = vmatprep.subr.bf16.mxu0 %v789_v10  ;;  %697 = vmatpush3.bf16.msra.mxu1 %v733_v40 }
 0x2e8   :  { %685 = vmatpush3.bf16.msra.mxu0 %v457_v29  ;;  %v444_v38 = vpop.trf.xlu1 }
 0x2eb   :  { %687 = vmatmul.mubr.msk.bf16.vlgmr.msra.gmra.mrb[8].mxu0 %vm452_vm7, %v444_v38 }
 0x3be   :  { %v493_v41 = vpop.f32.mrb[8].mxu0 }
 0x3bf   :  { %500 = vrot.lane.b32.xlu0 %v493_v41, %s791_s30  ;;  %v688_v42 = vpop.f32.mrb[9].mxu0 }
 0x3c0   :  { %v496_v43 = vpop.f32.mrb[10].mxu0 }
 0x3c1   :  { %v689_v44 = vpop.f32.mrb[11].mxu0 }
 0x431   :  { %v501_v45 = vpop.permute.xlu0 %500 }
 0x432   :  { %v504_v46 = vsel %vm503_vm8, %v871_v14, %v501_v45 }
 0x433   :  { %v505_v47 = vpack.c.bf16 %v504_v46, %v504_v46 }
 0x435   :  { %699 = vmatmul.mubr.msk.bf16.vlgmr.msra.gmra.mrb[8].mxu1 %vm545_vm9, %v505_v47 }
 0x508   :  { %v583_v49 = vpop.f32.mrb[8].mxu1 }
 0x509   :  { %v584_v50 = vadd.f32 %v632_v48, %v583_v49  ;;  %v700_v51 = vpop.f32.mrb[9].mxu1 }
 0x50a   :  { %v586_v52 = vpop.f32.mrb[10].mxu1 }
 0x50b   :  { %v589_v53 = vmax.f32 %v584_v50, 0.0  ;;  %v701_v54 = vpop.f32.mrb[11].mxu1 }
 0x50d   :  { %v590_v55 = vadd.f32 %v871_v14, %v589_v53 }
 0x50f   :  { %vm591_vm10 = vcmp.ge.f32.partialorder %v590_v55, 0.0  ;;  %v592_v56 = vmul.f32 0.01, %v590_v55 }
 0x511   :  { %v593_v57 = vsel %vm591_vm10, %v590_v55, %v592_v56 }
 0x512   :  { %594 = vst.msk [vmem:[#allocation2] sm:$0xff] %vm503_vm8, %v593_v57 }
 0x513   :  { %769 = shalt.err (!%p766_p4)
}
 0x514   :  { %s770_s13 = scalar_lea.hbm %s951_s8, 128 }
 0x515   :  { %p771_p5 = scmp.ne.s32.totalorder %s951_s8, %s770_s13  ;;  %p774_p6 = scmp.lt.u32.totalorder %s770_s13, %s951_s8 }
 0x517   :  { %p776_p7 = pnand %p774_p6, %p771_p5 }
 0x519   :  { %779 = shalt.err (!%p776_p7)
}
 0x51a   :  { %604 = dma.vmem_to_hbm [thread:$0]  %s602_s11, 128, %s951_s8, [#allocation3]  }
 0x51b   :  { %780 = dma.done.wait [#allocation3], 128  }
 0x51c   :  { %781 = vsyncadd [#allocation3], 4294967168 }
 0x51d   :  { %608 = vsyncpa [#allocation3], 1 }

</bundles_post_ra>
